<compile_context>
chip_gen: v6e
topology: v6e:2x2x1
jax: 0.10.0
libtpu: 0.0.40
codegen_flags: <defaults>
</compile_context>

<pallas_src>
import functools

import jax
import jax.numpy as jnp
from jax.experimental import pallas as pl
from jax.experimental.pallas import tpu as pltpu


LANE = 128          # lane-dim alignment (MXU / vreg lane width)
DEFAULT_TB = 128    # batch-tile rows per grid step


def _round_up(x, m):
    return ((x + m - 1) // m) * m


def _make_mlp_kernel(num_hidden_layers):
    """Kernel for `num_hidden_layers` (Linear+ReLU) blocks + final Linear.

    refs = (x_ref, w0, b0, w1, b1, ..., wL, bL, out_ref); all refs are VMEM tiles.
    x_ref is one (TB, K_pad) batch tile; weights/biases are full (padded) arrays.
    """

    def kernel(*refs):
        x_ref = refs[0]
        out_ref = refs[-1]
        params = refs[1:-1]

        h = x_ref[...]  # f32 (TB, K_pad)
        # Hidden layers: Linear -> ReLU -> Dropout (identity at eval).
        for i in range(num_hidden_layers):
            w = params[2 * i][...]
            b = params[2 * i + 1][...]          # (1, H_pad) broadcasts over rows
            h = jnp.dot(h, w, preferred_element_type=jnp.float32) + b
            h = jnp.maximum(h, 0.0)
        # Final Linear (no activation).
        w = params[2 * num_hidden_layers][...]
        b = params[2 * num_hidden_layers + 1][...]
        out_ref[...] = (
            jnp.dot(h, w, preferred_element_type=jnp.float32) + b
        ).astype(out_ref.dtype)

    return kernel


@functools.partial(jax.jit, static_argnames=("tb",))
def mlp_classifier_forward(x, weights, biases, *, tb=DEFAULT_TB):
    """Run the MLP forward pass in a single batch-gridded Pallas kernel.

    Args:
      x: [batch, input_size] float32.
      weights: tuple of arrays, layer i has shape (in_i, out_i) (already transposed).
      biases:  tuple of arrays, layer i has shape (out_i,) or (1, out_i).
    Returns:
      [batch, num_classes] float32 logits.
    """
    num_layers = len(weights)
    num_hidden = num_layers - 1
    batch, input_size = x.shape
    num_classes = weights[-1].shape[1]

    # ---- Pad shapes: lane dims to multiples of 128, batch to a multiple of TB. ----
    dims = [input_size] + [w.shape[1] for w in weights]
    pdims = [_round_up(d, LANE) for d in dims]
    pbatch = _round_up(batch, tb)

    xp = jnp.zeros((pbatch, pdims[0]), jnp.float32)
    xp = xp.at[:batch, :input_size].set(x.astype(jnp.float32))

    pws, pbs = [], []
    for i, (w, b) in enumerate(zip(weights, biases)):
        pw = jnp.zeros((pdims[i], pdims[i + 1]), jnp.float32)
        pw = pw.at[: w.shape[0], : w.shape[1]].set(w.astype(jnp.float32))
        b2 = jnp.reshape(b, (1, -1)).astype(jnp.float32)
        pb = jnp.zeros((1, pdims[i + 1]), jnp.float32)
        pb = pb.at[:, : b2.shape[1]].set(b2)
        pws.append(pw)
        pbs.append(pb)

    # ---- Specs: x/out tiled over the batch grid, params resident (constant index). ----
    grid = (pbatch // tb,)

    in_specs = [pl.BlockSpec((tb, pdims[0]), lambda i: (i, 0))]
    args = [xp]
    for pw, pb in zip(pws, pbs):
        in_specs.append(pl.BlockSpec(pw.shape, lambda i: (0, 0)))
        in_specs.append(pl.BlockSpec(pb.shape, lambda i: (0, 0)))
        args.append(pw)
        args.append(pb)

    out_specs = pl.BlockSpec((tb, pdims[-1]), lambda i: (i, 0))

    # ---- Advisory cost estimate for the XLA scheduler. ----
    flops = 2 * pbatch * sum(pdims[i] * pdims[i + 1] for i in range(num_layers))
    bytes_accessed = 4 * (
        pbatch * pdims[0]
        + sum(pw.size for pw in pws)
        + sum(pb.size for pb in pbs)
        + pbatch * pdims[-1]
    )
    cost = pl.CostEstimate(
        flops=flops, transcendentals=0, bytes_accessed=bytes_accessed
    )

    kernel = _make_mlp_kernel(num_hidden)

    out_padded = pl.pallas_call(
        kernel,
        out_shape=jax.ShapeDtypeStruct((pbatch, pdims[-1]), jnp.float32),
        grid=grid,
        in_specs=in_specs,
        out_specs=out_specs,
        compiler_params=pltpu.CompilerParams(
            dimension_semantics=("parallel",),
        ),
        cost_estimate=cost,
    )(*args)

    # Slice away batch/lane padding so padded logits never leak downstream.
    return out_padded[:batch, :num_classes]


def init_mlp_params(key, input_size, hidden_sizes, num_classes):
    """Deterministic parameter init (Kaiming-uniform-ish, like nn.Linear default)."""
    sizes = [input_size] + list(hidden_sizes) + [num_classes]
    weights, biases = [], []
    for i in range(len(sizes) - 1):
        fan_in, fan_out = sizes[i], sizes[i + 1]
        key, kw, kb = jax.random.split(key, 3)
        bound = 1.0 / jnp.sqrt(fan_in)
        # Stored pre-transposed as (in, out) for the kernel.
        w = jax.random.uniform(
            kw, (fan_in, fan_out), minval=-bound, maxval=bound, dtype=jnp.float32
        )
        b = jax.random.uniform(
            kb, (1, fan_out), minval=-bound, maxval=bound, dtype=jnp.float32
        )
        weights.append(w)
        biases.append(b)
    return weights, biases


def mlp_reference(x, weights, biases):
    """Pure-JAX reference (eval mode: dropout = identity)."""
    h = x
    for i in range(len(weights) - 1):
        h = jnp.maximum(h @ weights[i] + biases[i], 0.0)
    return h @ weights[-1] + biases[-1]


if __name__ == "__main__":
    # Shapes consistent with the module's forward:
    #   MLPClassifierGPU(input_size=32, hidden_sizes=[64, 32], num_classes=10)
    # batch=256 exercises the batch grid (2 steps of TB=128); data is still tiny.
    batch = 256
    input_size = 32
    hidden_sizes = [64, 32]
    num_classes = 10

    key = jax.random.PRNGKey(0)
    key, kx = jax.random.split(key)
    x = jax.random.normal(kx, (batch, input_size), dtype=jnp.float32)

    weights, biases = init_mlp_params(key, input_size, hidden_sizes, num_classes)

    out = mlp_classifier_forward(x, tuple(weights), tuple(biases))
    out = jax.block_until_ready(out)

    ref = mlp_reference(x, weights, biases)
    assert out.shape == (batch, num_classes), out.shape
    assert jnp.allclose(out, ref, atol=1e-4, rtol=1e-4), "mismatch vs reference"

    print("KERNEL_OK")
</pallas_src>

<mosaic_0001>
module attributes {stable_mosaic.version = 11 : i64} {
  func.func @kernel(%arg0: i32, %arg1: memref<128x128xf32, #tpu.memory_space<vmem>>, %arg2: memref<128x128xf32, #tpu.memory_space<vmem>>, %arg3: memref<1x128xf32, #tpu.memory_space<vmem>>, %arg4: memref<128x128xf32, #tpu.memory_space<vmem>>, %arg5: memref<1x128xf32, #tpu.memory_space<vmem>>, %arg6: memref<128x128xf32, #tpu.memory_space<vmem>>, %arg7: memref<1x128xf32, #tpu.memory_space<vmem>>, %arg8: memref<128x128xf32, #tpu.memory_space<vmem>>) attributes {dimension_semantics = [#tpu.dimension_semantics<parallel>], iteration_bounds = array<i64: 2>, scalar_prefetch = 0 : i64, scratch_operands = 0 : i64, tpu.core_type = #tpu.core_type<tc>, window_params = [{transform_indices = @transform_0, window_bounds = array<i64: 128, 128>}, {pipeline_mode = #tpu.pipeline_mode<synchronous>, transform_indices = @transform_1, window_bounds = array<i64: 128, 128>}, {pipeline_mode = #tpu.pipeline_mode<synchronous>, transform_indices = @transform_2, window_bounds = array<i64: 1, 128>}, {pipeline_mode = #tpu.pipeline_mode<synchronous>, transform_indices = @transform_3, window_bounds = array<i64: 128, 128>}, {pipeline_mode = #tpu.pipeline_mode<synchronous>, transform_indices = @transform_4, window_bounds = array<i64: 1, 128>}, {pipeline_mode = #tpu.pipeline_mode<synchronous>, transform_indices = @transform_5, window_bounds = array<i64: 128, 128>}, {pipeline_mode = #tpu.pipeline_mode<synchronous>, transform_indices = @transform_6, window_bounds = array<i64: 1, 128>}, {transform_indices = @transform_7, window_bounds = array<i64: 128, 128>}]} {
    %c0 = arith.constant 0 : index
    %c0_0 = arith.constant 0 : index
    %0 = vector.load %arg1[%c0, %c0_0] : memref<128x128xf32, #tpu.memory_space<vmem>>, vector<128x128xf32>
    %c0_1 = arith.constant 0 : index
    %c0_2 = arith.constant 0 : index
    %1 = vector.load %arg2[%c0_1, %c0_2] : memref<128x128xf32, #tpu.memory_space<vmem>>, vector<128x128xf32>
    %c0_3 = arith.constant 0 : index
    %c0_4 = arith.constant 0 : index
    %2 = vector.load %arg3[%c0_3, %c0_4] : memref<1x128xf32, #tpu.memory_space<vmem>>, vector<1x128xf32>
    %cst = arith.constant dense<0.000000e+00> : vector<128x128xf32>
    %3 = tpu.matmul %0, %1, %cst {dimension_numbers = #tpu.dot_dimension_numbers<[1], [0], [0], [1], [0, 0, 1, 1], [], []>} : vector<128x128xf32>, vector<128x128xf32>, vector<128x128xf32> -> vector<128x128xf32>
    %4 = vector.broadcast %2 : vector<1x128xf32> to vector<128x128xf32>
    %5 = arith.addf %3, %4 : vector<128x128xf32>
    %cst_5 = arith.constant 0.000000e+00 : f32
    %6 = vector.broadcast %cst_5 : f32 to vector<128x128xf32>
    %7 = arith.maximumf %5, %6 : vector<128x128xf32>
    %c0_6 = arith.constant 0 : index
    %c0_7 = arith.constant 0 : index
    %8 = vector.load %arg4[%c0_6, %c0_7] : memref<128x128xf32, #tpu.memory_space<vmem>>, vector<128x128xf32>
    %c0_8 = arith.constant 0 : index
    %c0_9 = arith.constant 0 : index
    %9 = vector.load %arg5[%c0_8, %c0_9] : memref<1x128xf32, #tpu.memory_space<vmem>>, vector<1x128xf32>
    %cst_10 = arith.constant dense<0.000000e+00> : vector<128x128xf32>
    %10 = tpu.matmul %7, %8, %cst_10 {dimension_numbers = #tpu.dot_dimension_numbers<[1], [0], [0], [1], [0, 0, 1, 1], [], []>} : vector<128x128xf32>, vector<128x128xf32>, vector<128x128xf32> -> vector<128x128xf32>
    %11 = vector.broadcast %9 : vector<1x128xf32> to vector<128x128xf32>
    %12 = arith.addf %10, %11 : vector<128x128xf32>
    %cst_11 = arith.constant 0.000000e+00 : f32
    %13 = vector.broadcast %cst_11 : f32 to vector<128x128xf32>
    %14 = arith.maximumf %12, %13 : vector<128x128xf32>
    %c0_12 = arith.constant 0 : index
    %c0_13 = arith.constant 0 : index
    %15 = vector.load %arg6[%c0_12, %c0_13] : memref<128x128xf32, #tpu.memory_space<vmem>>, vector<128x128xf32>
    %c0_14 = arith.constant 0 : index
    %c0_15 = arith.constant 0 : index
    %16 = vector.load %arg7[%c0_14, %c0_15] : memref<1x128xf32, #tpu.memory_space<vmem>>, vector<1x128xf32>
    %cst_16 = arith.constant dense<0.000000e+00> : vector<128x128xf32>
    %17 = tpu.matmul %14, %15, %cst_16 {dimension_numbers = #tpu.dot_dimension_numbers<[1], [0], [0], [1], [0, 0, 1, 1], [], []>} : vector<128x128xf32>, vector<128x128xf32>, vector<128x128xf32> -> vector<128x128xf32>
    %18 = vector.broadcast %16 : vector<1x128xf32> to vector<128x128xf32>
    %19 = arith.addf %17, %18 : vector<128x128xf32>
    %c0_17 = arith.constant 0 : index
    %c0_18 = arith.constant 0 : index
    %20 = vector.load %arg8[%c0_17, %c0_18] : memref<128x128xf32, #tpu.memory_space<vmem>>, vector<128x128xf32>
    tpu.vector_store %arg8[%c0_17, %c0_18], %19 {strides = array<i32>} : memref<128x128xf32, #tpu.memory_space<vmem>>, vector<128x128xf32>,
    return
  }
  func.func @transform_0(%arg0: i32) -> (i32, i32) {
    %c0_i32 = arith.constant 0 : i32
    %c0_i32_0 = arith.constant 0 : i32
    return %arg0, %c0_i32 : i32, i32
  }
  func.func @transform_1(%arg0: i32) -> (i32, i32) {
    %c0_i32 = arith.constant 0 : i32
    %c0_i32_0 = arith.constant 0 : i32
    %c0_i32_1 = arith.constant 0 : i32
    return %c0_i32, %c0_i32_0 : i32, i32
  }
  func.func @transform_2(%arg0: i32) -> (i32, i32) {
    %c0_i32 = arith.constant 0 : i32
    %c0_i32_0 = arith.constant 0 : i32
    %c0_i32_1 = arith.constant 0 : i32
    return %c0_i32, %c0_i32_0 : i32, i32
  }
  func.func @transform_3(%arg0: i32) -> (i32, i32) {
    %c0_i32 = arith.constant 0 : i32
    %c0_i32_0 = arith.constant 0 : i32
    %c0_i32_1 = arith.constant 0 : i32
    return %c0_i32, %c0_i32_0 : i32, i32
  }
  func.func @transform_4(%arg0: i32) -> (i32, i32) {
    %c0_i32 = arith.constant 0 : i32
    %c0_i32_0 = arith.constant 0 : i32
    %c0_i32_1 = arith.constant 0 : i32
    return %c0_i32, %c0_i32_0 : i32, i32
  }
  func.func @transform_5(%arg0: i32) -> (i32, i32) {
    %c0_i32 = arith.constant 0 : i32
    %c0_i32_0 = arith.constant 0 : i32
    %c0_i32_1 = arith.constant 0 : i32
    return %c0_i32, %c0_i32_0 : i32, i32
  }
  func.func @transform_6(%arg0: i32) -> (i32, i32) {
    %c0_i32 = arith.constant 0 : i32
    %c0_i32_0 = arith.constant 0 : i32
    %c0_i32_1 = arith.constant 0 : i32
    return %c0_i32, %c0_i32_0 : i32, i32
  }
  func.func @transform_7(%arg0: i32) -> (i32, i32) {
    %c0_i32 = arith.constant 0 : i32
    %c0_i32_0 = arith.constant 0 : i32
    return %arg0, %c0_i32 : i32, i32
  }
}

</mosaic_0001>

<bundles_post_ra>
// kernel: mlp_classifier_forward.1
= control target key start
LH: loop header
LB: loop body
LE: loop exit
PB: predicated region body
PF: predicated region fallthrough
CT: control target
= control target key end

     0   :  { %s1272_s24 = smov 0   ;;  %s1551_s0 = inlined_call_operand.vmem [shape: f32[256,128], index: 0, kind: input, shape index: {}]   ;;  %s1552_s1 = inlined_call_operand.vmem [shape: f32[128,128], index: 1, kind: input, shape index: {}]   ;;  %s1553_s2 = inlined_call_operand.vmem [shape: f32[1,128], index: 2, kind: input, shape index: {}]   ;;  %s1554_s3 = inlined_call_operand.vmem [shape: f32[128,128], index: 3, kind: input, shape index: {}]   ;;  %s1555_s4 = inlined_call_operand.vmem [shape: f32[1,128], index: 4, kind: input, shape index: {}]   ;;  %s1556_s5 = inlined_call_operand.vmem [shape: f32[128,128], index: 5, kind: input, shape index: {}]   ;;  %s1557_s6 = inlined_call_operand.vmem [shape: f32[1,128], index: 6, kind: input, shape index: {}]   ;;  %s1558_s7 = inlined_call_operand.vmem [shape: f32[256,128], index: 7, kind: output, shape index: {}]  }
   0x1 LB: > { %s906_s25 = sadd.s32 4294967295, %s1230_s24   ;;  %p910_p0 = scmp.ge.s32.totalorder %s1230_s24, 1  ;;  %s1230_s24 = sphi %s1272_s24, %s17_s24  }
   0x2   : > { %p238_p1 = scmp.lt.s32.totalorder %s1230_s24, 3 }
   0x4   : > { %p239_p2 = pnand %p910_p0, %p238_p1 }
   0x5   : > { %s911_s30 = sshll.u32 (!%p239_p2), %s906_s25, 4 }
   0x6   : > { %242 = sbr.rel (%p239_p2) target bundleno = 670 (0x29e), region = 48  ;;  %p271_p3 = scmp.lt.s32.totalorder (!%p239_p2), %s911_s30, 31 }
   0xb   : > { %v313_v0 = vld [vmem:[%s1552_s1 + $0x78] sm:$0xff]  ;;  %v312_v1 = vld [vmem:[%s1552_s1 + $0x70] sm:$0xff]  ;;  %v311_v2 = vld [vmem:[%s1552_s1 + $0x68] sm:$0xff]  ;;  %s1560_s30 = smov (!%p271_p3, %s911_s30), 31 }
   0xc   : > { %1016 = vmatprep.subr.mxu0 %v313_v0  ;;  %v310_v3 = vld [vmem:[%s1552_s1 + $0x60] sm:$0xff]  ;;  %s912_s12 = sshll.u32 %s1560_s30, 3  ;;  %v497_v4 = vld [vmem:[%s1554_s3 + $0x78] sm:$0xff]  ;;  %v496_v6 = vld [vmem:[%s1554_s3 + $0x70] sm:$0xff] }
   0xd   : > { %1017 = vmatpush3.msra.mxu0 %v313_v0  ;;  %v309_v5 = vld [vmem:[%s1552_s1 + $0x58] sm:$0xff]  ;;  %s1306_s19 = scalar_lea.vmem %s1551_s0, %s912_s12  ;;  %1072 = vmatprep.subr.mxu1 %v497_v4  ;;  %v308_v8 = vld [vmem:[%s1552_s1 + $0x50] sm:$0xff]  ;;  %v495_v9 = vld [vmem:[%s1554_s3 + $0x68] sm:$0xff]  ;;  %s1530_s13 = scalar_lea.vmem %s1558_s7, %s912_s12 }
   0xe   : > { %1018 = vmatprep.subr.mxu0 %v312_v1  ;;  %v282_v7 = vld [vmem:[%s1306_s19] sm:$0xff]  ;;  %1073 = vmatpush3.msra.mxu1 %v497_v4  ;;  %v307_v10 = vld [vmem:[%s1552_s1 + $0x48] sm:$0xff]  ;;  %v493_v13 = vld [vmem:[%s1554_s3 + $0x58] sm:$0xff] }
   0xf   : > { %1019 = vmatpush3.msra.mxu0 %v312_v1  ;;  %1048 = vmatprep.mubr.f32.mxu0 %v282_v7  ;;  %v494_v11 = vld [vmem:[%s1554_s3 + $0x60] sm:$0xff]  ;;  %v305_v14 = vld [vmem:[%s1552_s1 + $0x38] sm:$0xff]  ;;  %v492_v15 = vld [vmem:[%s1554_s3 + $0x50] sm:$0xff] }
  0x10   : > { %1020 = vmatprep.subr.mxu0 %v311_v2  ;;  %1074 = vmatprep.subr.mxu1 %v496_v6  ;;  %v306_v12 = vld [vmem:[%s1552_s1 + $0x40] sm:$0xff]  ;;  %v304_v16 = vld [vmem:[%s1552_s1 + $0x30] sm:$0xff]  ;;  %v491_v17 = vld [vmem:[%s1554_s3 + $0x48] sm:$0xff] }
  0x11   : > { %1021 = vmatpush3.msra.mxu0 %v311_v2  ;;  %1075 = vmatpush3.msra.mxu1 %v496_v6  ;;  %v303_v18 = vld [vmem:[%s1552_s1 + $0x28] sm:$0xff]  ;;  %v490_v19 = vld [vmem:[%s1554_s3 + $0x40] sm:$0xff]  ;;  %v489_v21 = vld [vmem:[%s1554_s3 + $0x38] sm:$0xff] }
  0x12   : > { %1022 = vmatprep.subr.mxu0 %v310_v3  ;;  %1076 = vmatprep.subr.mxu1 %v495_v9  ;;  %v302_v20 = vld [vmem:[%s1552_s1 + $0x20] sm:$0xff]  ;;  %v301_v22 = vld [vmem:[%s1552_s1 + $0x18] sm:$0xff]  ;;  %v488_v23 = vld [vmem:[%s1554_s3 + $0x30] sm:$0xff] }
  0x13   : > { %1023 = vmatpush3.msra.mxu0 %v310_v3  ;;  %1077 = vmatpush3.msra.mxu1 %v495_v9  ;;  %v300_v24 = vld [vmem:[%s1552_s1 + $0x10] sm:$0xff]  ;;  %v487_v25 = vld [vmem:[%s1554_s3 + $0x28] sm:$0xff]  ;;  %v486_v27 = vld [vmem:[%s1554_s3 + $0x20] sm:$0xff] }
  0x14   : > { %1024 = vmatprep.subr.mxu0 %v309_v5  ;;  %1078 = vmatprep.subr.mxu1 %v494_v11  ;;  %v299_v26 = vld [vmem:[%s1552_s1 + $0x8] sm:$0xff]  ;;  %v298_v28 = vld [vmem:[%s1552_s1] sm:$0xff]  ;;  %v284_v30 = vld [vmem:[%s1306_s19 + $0x10] sm:$0xff] }
  0x15   : > { %1025 = vmatpush3.msra.mxu0 %v309_v5  ;;  %1079 = vmatpush3.msra.mxu1 %v494_v11  ;;  %v283_v29 = vld [vmem:[%s1306_s19 + $0x8] sm:$0xff]  ;;  %v285_v31 = vld [vmem:[%s1306_s19 + $0x18] sm:$0xff]  ;;  %v286_v32 = vld [vmem:[%s1306_s19 + $0x20] sm:$0xff] }
  0x16   : > { %1026 = vmatprep.subr.mxu0 %v308_v8  ;;  %1080 = vmatprep.subr.mxu1 %v493_v13  ;;  %v287_v33 = vld [vmem:[%s1306_s19 + $0x28] sm:$0xff]  ;;  %v288_v34 = vld [vmem:[%s1306_s19 + $0x30] sm:$0xff]  ;;  %v289_v35 = vld [vmem:[%s1306_s19 + $0x38] sm:$0xff] }
  0x17   : > { %1027 = vmatpush3.msra.mxu0 %v308_v8  ;;  %1081 = vmatpush3.msra.mxu1 %v493_v13  ;;  %v290_v36 = vld [vmem:[%s1306_s19 + $0x40] sm:$0xff]  ;;  %v291_v37 = vld [vmem:[%s1306_s19 + $0x48] sm:$0xff]  ;;  %v292_v38 = vld [vmem:[%s1306_s19 + $0x50] sm:$0xff] }
  0x18   : > { %1028 = vmatprep.subr.mxu0 %v307_v10  ;;  %1082 = vmatprep.subr.mxu1 %v492_v15  ;;  %v293_v39 = vld [vmem:[%s1306_s19 + $0x58] sm:$0xff]  ;;  %v294_v40 = vld [vmem:[%s1306_s19 + $0x60] sm:$0xff]  ;;  %v295_v41 = vld [vmem:[%s1306_s19 + $0x68] sm:$0xff] }
  0x19   : > { %1029 = vmatpush3.msra.mxu0 %v307_v10  ;;  %1083 = vmatpush3.msra.mxu1 %v492_v15  ;;  %v296_v42 = vld [vmem:[%s1306_s19 + $0x70] sm:$0xff]  ;;  %v297_v43 = vld [vmem:[%s1306_s19 + $0x78] sm:$0xff]  ;;  %v483_v46 = vld [vmem:[%s1554_s3 + $0x8] sm:$0xff] }
  0x1a   : > { %1030 = vmatprep.subr.mxu0 %v306_v12  ;;  %1084 = vmatprep.subr.mxu1 %v491_v17  ;;  %v485_v44 = vld [vmem:[%s1554_s3 + $0x18] sm:$0xff]  ;;  %v484_v45 = vld [vmem:[%s1554_s3 + $0x10] sm:$0xff]  ;;  %v482_v47 = vld [vmem:[%s1554_s3] sm:$0xff] }
  0x1b   : > { %1031 = vmatpush3.msra.mxu0 %v306_v12  ;;  %1085 = vmatpush3.msra.mxu1 %v491_v17  ;;  %v681_v48 = vld [vmem:[%s1556_s5 + $0x78] sm:$0xff]  ;;  %v680_v49 = vld [vmem:[%s1556_s5 + $0x70] sm:$0xff]  ;;  %v679_v50 = vld [vmem:[%s1556_s5 + $0x68] sm:$0xff] }
  0x1c   : > { %1032 = vmatprep.subr.mxu0 %v305_v14  ;;  %1086 = vmatprep.subr.mxu1 %v490_v19  ;;  %v678_v51 = vld [vmem:[%s1556_s5 + $0x60] sm:$0xff]  ;;  %v1417_v52 = vld [vmem:[%s1556_s5 + $0x58] sm:$0xff]  ;;  %v1422_v53 = vld [vmem:[%s1556_s5 + $0x50] sm:$0xff] }
  0x1d   : > { %1033 = vmatpush3.msra.mxu0 %v305_v14  ;;  %1087 = vmatpush3.msra.mxu1 %v490_v19  ;;  %v1429_v54 = vld [vmem:[%s1556_s5 + $0x48] sm:$0xff]  ;;  %v1436_v55 = vld [vmem:[%s1556_s5 + $0x40] sm:$0xff]  ;;  %v1443_v56 = vld [vmem:[%s1556_s5 + $0x38] sm:$0xff] }
  0x1e   : > { %1034 = vmatprep.subr.mxu0 %v304_v16  ;;  %1088 = vmatprep.subr.mxu1 %v489_v21  ;;  %v1450_v57 = vld [vmem:[%s1556_s5 + $0x30] sm:$0xff]  ;;  %v1457_v58 = vld [vmem:[%s1556_s5 + $0x28] sm:$0xff]  ;;  %v1464_v59 = vld [vmem:[%s1556_s5 + $0x20] sm:$0xff] }
  0x1f   : > { %1035 = vmatpush3.msra.mxu0 %v304_v16  ;;  %1089 = vmatpush3.msra.mxu1 %v489_v21  ;;  %v1473_v60 = vld [vmem:[%s1553_s2] ss:$0 sm:$0xff] }
  0x20   : > { %1036 = vmatprep.subr.mxu0 %v303_v18  ;;  %1090 = vmatprep.subr.mxu1 %v488_v23 }
  0x21   : > { %1037 = vmatpush3.msra.mxu0 %v303_v18  ;;  %1091 = vmatpush3.msra.mxu1 %v488_v23 }
  0x22   : > { %1038 = vmatprep.subr.mxu0 %v302_v20  ;;  %1092 = vmatprep.subr.mxu1 %v487_v25 }
  0x23   : > { %1039 = vmatpush3.msra.mxu0 %v302_v20  ;;  %1093 = vmatpush3.msra.mxu1 %v487_v25 }
  0x24   : > { %1040 = vmatprep.subr.mxu0 %v301_v22  ;;  %1094 = vmatprep.subr.mxu1 %v486_v27 }
  0x25   : > { %1041 = vmatpush3.msra.mxu0 %v301_v22  ;;  %1095 = vmatpush3.msra.mxu1 %v486_v27 }
  0x26   : > { %1042 = vmatprep.subr.mxu0 %v300_v24  ;;  %1096 = vmatprep.subr.mxu1 %v485_v44 }
  0x27   : > { %1043 = vmatpush3.msra.mxu0 %v300_v24  ;;  %1097 = vmatpush3.msra.mxu1 %v485_v44 }
  0x28   : > { %1044 = vmatprep.subr.mxu0 %v299_v26  ;;  %1098 = vmatprep.subr.mxu1 %v484_v45 }
  0x29   : > { %1045 = vmatpush3.msra.mxu0 %v299_v26  ;;  %1099 = vmatpush3.msra.mxu1 %v484_v45  ;;  %v669_v45 = vld [vmem:[%s1556_s5 + $0x18] sm:$0xff] }
  0x2a   : > { %1046 = vmatprep.subr.mxu0 %v298_v28  ;;  %1100 = vmatprep.subr.mxu1 %v483_v46 }
  0x2b   : > { %1047 = vmatpush3.msra.mxu0 %v298_v28  ;;  %1101 = vmatpush3.msra.mxu1 %v483_v46  ;;  %v668_v46 = vld [vmem:[%s1556_s5 + $0x10] sm:$0xff] }
  0x2c   : > { %1049 = vmatmul.mubr.f32.vlgmr.msra.gmra.mxu0 %v283_v29  ;;  %1102 = vmatprep.subr.mxu1 %v482_v47 }
  0x2d   : > { %1051 = vmatprep.mubr.f32.mxu0 %v284_v30  ;;  %1103 = vmatpush3.msra.mxu1 %v482_v47  ;;  %v667_v47 = vld [vmem:[%s1556_s5 + $0x8] sm:$0xff] }
  0x2e   : > { %1128 = vmatprep.subr.mxu0 %v681_v48  ;;  %1184 = vmatprep.subr.mxu1 %v681_v48 }
  0x2f   : > { %1129 = vmatpush3.msra.mxu0 %v681_v48 }
  0x30   : > { %1052 = vmatmul.mubr.f32.gmra.mxu0 %v285_v31  ;;  %1130 = vmatprep.subr.mxu0 %v680_v49 }
  0x31   : > { %1054 = vmatprep.mubr.f32.mxu0 %v286_v32  ;;  %1131 = vmatpush3.msra.mxu0 %v680_v49 }
  0x32   : > { %1132 = vmatprep.subr.mxu0 %v679_v50 }
  0x33   : > { %1133 = vmatpush3.msra.mxu0 %v679_v50 }
  0x34   : > { %1055 = vmatmul.mubr.f32.gmra.mxu0 %v287_v33  ;;  %1134 = vmatprep.subr.mxu0 %v678_v51 }
  0x35   : > { %1057 = vmatprep.mubr.f32.mxu0 %v288_v34  ;;  %1135 = vmatpush3.msra.mxu0 %v678_v51 }
  0x36   : > { %1136 = vmatprep.subr.mxu0 %v1417_v52 }
  0x37   : > { %1137 = vmatpush3.msra.mxu0 %v1417_v52 }
  0x38   : > { %1058 = vmatmul.mubr.f32.gmra.mxu0 %v289_v35  ;;  %1138 = vmatprep.subr.mxu0 %v1422_v53 }
  0x39   : > { %1060 = vmatprep.mubr.f32.mxu0 %v290_v36  ;;  %1139 = vmatpush3.msra.mxu0 %v1422_v53 }
  0x3a   : > { %1140 = vmatprep.subr.mxu0 %v1429_v54 }
  0x3b   : > { %1141 = vmatpush3.msra.mxu0 %v1429_v54 }
  0x3c   : > { %1061 = vmatmul.mubr.f32.gmra.mxu0 %v291_v37  ;;  %1142 = vmatprep.subr.mxu0 %v1436_v55 }
  0x3d   : > { %1063 = vmatprep.mubr.f32.mxu0 %v292_v38  ;;  %1143 = vmatpush3.msra.mxu0 %v1436_v55 }
  0x3e   : > { %1144 = vmatprep.subr.mxu0 %v1443_v56 }
  0x3f   : > { %1145 = vmatpush3.msra.mxu0 %v1443_v56 }
  0x40   : > { %1064 = vmatmul.mubr.f32.gmra.mxu0 %v293_v39  ;;  %1146 = vmatprep.subr.mxu0 %v1450_v57 }
  0x41   : > { %1066 = vmatprep.mubr.f32.mxu0 %v294_v40  ;;  %1147 = vmatpush3.msra.mxu0 %v1450_v57 }
  0x42   : > { %1148 = vmatprep.subr.mxu0 %v1457_v58 }
  0x43   : > { %1149 = vmatpush3.msra.mxu0 %v1457_v58 }
  0x44   : > { %1067 = vmatmul.mubr.f32.gmra.mxu0 %v295_v41  ;;  %1150 = vmatprep.subr.mxu0 %v1464_v59 }
  0x45   : > { %1069 = vmatprep.mubr.f32.mxu0 %v296_v42  ;;  %1151 = vmatpush3.msra.mxu0 %v1464_v59 }
  0x46   : > { %1152 = vmatprep.subr.mxu0 %v669_v45 }
  0x47   : > { %1153 = vmatpush3.msra.mxu0 %v669_v45 }
  0x48   : > { %1070 = vmatmul.mubr.f32.gmra.mxu0 %v297_v43  ;;  %1154 = vmatprep.subr.mxu0 %v668_v46 }
  0x49   : > { %1155 = vmatpush3.msra.mxu0 %v668_v46 }
  0x4a   : > { %1156 = vmatprep.subr.mxu0 %v667_v47 }
  0x4b   : > { %1157 = vmatpush3.msra.mxu0 %v667_v47 }
  0xec   : > { %v1050_v61 = vpop.f32.mrf.mxu0 }
  0xed   : > { %v393_v62 = vadd.f32 %v1050_v61, %v1473_v60 }
  0xee   : > { %v387_v63 = vpop.f32.mrf.mxu0 }
  0xef   : > { %v388_v0 = vadd.f32 %v1473_v60, %v387_v63  ;;  %v467_v3 = vmax.f32 %v393_v62, 0.0 }
  0xf0   : > { %v1053_v1 = vpop.f32.mrf.mxu0 }
  0xf1   : > { %v466_v2 = vmax.f32 %v388_v0, 0.0  ;;  %v403_v4 = vadd.f32 %v1053_v1, %v1473_v60 }
  0xf2   : > { %v397_v5 = vpop.f32.mrf.mxu0 }
  0xf3   : > { %v398_v6 = vadd.f32 %v1473_v60, %v397_v5  ;;  %1104 = vmatprep.mubr.f32.mxu1 %v466_v2  ;;  %v469_v9 = vmax.f32 %v403_v4, 0.0 }
  0xf4   : > { %v1056_v7 = vpop.f32.mrf.mxu0  ;;  %1105 = vmatmul.mubr.f32.vlgmr.msra.gmra.mxu1 %v467_v3 }
  0xf5   : > { %v468_v8 = vmax.f32 %v398_v6, 0.0  ;;  %1200 = vmatpush3.msra.mxu1 %v681_v48  ;;  %v413_v10 = vadd.f32 %v1056_v7, %v1473_v60  ;;  %v666_v48 = vld [vmem:[%s1556_s5] sm:$0xff] }
  0xf6   : > { %v407_v11 = vpop.f32.mrf.mxu0  ;;  %1185 = vmatprep.subr.mxu1 %v680_v49  ;;  %1158 = vmatprep.subr.mxu0 %v666_v48 }
  0xf7   : > { %v408_v12 = vadd.f32 %v1473_v60, %v407_v11  ;;  %1107 = vmatprep.mubr.f32.mxu1 %v468_v8  ;;  %1201 = vmatpush3.msra.mxu1 %v680_v49  ;;  %v471_v15 = vmax.f32 %v413_v10, 0.0  ;;  %v916_v49 = vld [vmem:[%s1555_s4] ss:$0 sm:$0xff] }
  0xf8   : > { %v1059_v13 = vpop.f32.mrf.mxu0  ;;  %1108 = vmatmul.mubr.f32.gmra.mxu1 %v469_v9  ;;  %1186 = vmatprep.subr.mxu1 %v679_v50 }
  0xf9   : > { %v470_v14 = vmax.f32 %v408_v12, 0.0  ;;  %1202 = vmatpush3.msra.mxu1 %v679_v50  ;;  %v423_v16 = vadd.f32 %v1059_v13, %v1473_v60  ;;  %1159 = vmatpush3.msra.mxu0 %v666_v48 }
  0xfa   : > { %v417_v17 = vpop.f32.mrf.mxu0  ;;  %1187 = vmatprep.subr.mxu1 %v678_v51 }
  0xfb   : > { %v418_v18 = vadd.f32 %v1473_v60, %v417_v17  ;;  %1110 = vmatprep.mubr.f32.mxu1 %v470_v14  ;;  %1203 = vmatpush3.msra.mxu1 %v678_v51  ;;  %v473_v21 = vmax.f32 %v423_v16, 0.0 }
  0xfc   : > { %v1062_v19 = vpop.f32.mrf.mxu0  ;;  %1111 = vmatmul.mubr.f32.gmra.mxu1 %v471_v15  ;;  %1188 = vmatprep.subr.mxu1 %v1417_v52 }
  0xfd   : > { %v472_v20 = vmax.f32 %v418_v18, 0.0  ;;  %1204 = vmatpush3.msra.mxu1 %v1417_v52  ;;  %v433_v22 = vadd.f32 %v1062_v19, %v1473_v60 }
  0xfe   : > { %v427_v23 = vpop.f32.mrf.mxu0  ;;  %1189 = vmatprep.subr.mxu1 %v1422_v53 }
  0xff   : > { %v428_v24 = vadd.f32 %v1473_v60, %v427_v23  ;;  %1113 = vmatprep.mubr.f32.mxu1 %v472_v20  ;;  %1205 = vmatpush3.msra.mxu1 %v1422_v53  ;;  %v475_v27 = vmax.f32 %v433_v22, 0.0 }
 0x100   : > { %v1065_v25 = vpop.f32.mrf.mxu0  ;;  %1114 = vmatmul.mubr.f32.gmra.mxu1 %v473_v21  ;;  %1190 = vmatprep.subr.mxu1 %v1429_v54 }
 0x101   : > { %v474_v26 = vmax.f32 %v428_v24, 0.0  ;;  %1206 = vmatpush3.msra.mxu1 %v1429_v54  ;;  %v443_v28 = vadd.f32 %v1065_v25, %v1473_v60 }
 0x102   : > { %v437_v29 = vpop.f32.mrf.mxu0  ;;  %1191 = vmatprep.subr.mxu1 %v1436_v55 }
 0x103   : > { %v438_v30 = vadd.f32 %v1473_v60, %v437_v29  ;;  %1116 = vmatprep.mubr.f32.mxu1 %v474_v26  ;;  %1207 = vmatpush3.msra.mxu1 %v1436_v55  ;;  %v477_v33 = vmax.f32 %v443_v28, 0.0 }
 0x104   : > { %v1068_v31 = vpop.f32.mrf.mxu0  ;;  %1117 = vmatmul.mubr.f32.gmra.mxu1 %v475_v27  ;;  %1192 = vmatprep.subr.mxu1 %v1443_v56 }
 0x105   : > { %v476_v32 = vmax.f32 %v438_v30, 0.0  ;;  %1208 = vmatpush3.msra.mxu1 %v1443_v56  ;;  %v453_v34 = vadd.f32 %v1068_v31, %v1473_v60 }
 0x106   : > { %v447_v35 = vpop.f32.mrf.mxu0  ;;  %1193 = vmatprep.subr.mxu1 %v1450_v57 }
 0x107   : > { %v448_v36 = vadd.f32 %v1473_v60, %v447_v35  ;;  %1119 = vmatprep.mubr.f32.mxu1 %v476_v32  ;;  %1209 = vmatpush3.msra.mxu1 %v1450_v57  ;;  %v479_v39 = vmax.f32 %v453_v34, 0.0  ;;  %v917_v34 = vld [vmem:[%s1557_s6] ss:$0 sm:$0xff] }
 0x108   : > { %v1071_v37 = vpop.f32.mrf.mxu0  ;;  %1120 = vmatmul.mubr.f32.gmra.mxu1 %v477_v33  ;;  %1194 = vmatprep.subr.mxu1 %v1457_v58 }
 0x109   : > { %v478_v38 = vmax.f32 %v448_v36, 0.0  ;;  %1210 = vmatpush3.msra.mxu1 %v1457_v58  ;;  %v463_v40 = vadd.f32 %v1071_v37, %v1473_v60 }
 0x10a   : > { %v457_v41 = vpop.f32.mrf.mxu0  ;;  %1195 = vmatprep.subr.mxu1 %v1464_v59 }
 0x10b   : > { %v458_v42 = vadd.f32 %v1473_v60, %v457_v41  ;;  %1122 = vmatprep.mubr.f32.mxu1 %v478_v38  ;;  %1211 = vmatpush3.msra.mxu1 %v1464_v59  ;;  %v481_v44 = vmax.f32 %v463_v40, 0.0 }
 0x10c   : > { %1123 = vmatmul.mubr.f32.gmra.mxu1 %v479_v39  ;;  %1196 = vmatprep.subr.mxu1 %v669_v45 }
 0x10d   : > { %v480_v43 = vmax.f32 %v458_v42, 0.0  ;;  %1212 = vmatpush3.msra.mxu1 %v669_v45 }
 0x10e   : > { %1197 = vmatprep.subr.mxu1 %v668_v46 }
 0x10f   : > { %1125 = vmatprep.mubr.f32.mxu1 %v480_v43  ;;  %1213 = vmatpush3.msra.mxu1 %v668_v46 }
 0x110   : > { %1126 = vmatmul.mubr.f32.gmra.mxu1 %v481_v44  ;;  %1198 = vmatprep.subr.mxu1 %v667_v47 }
 0x111   : > { %1214 = vmatpush3.msra.mxu1 %v667_v47 }
 0x112   : > { %1199 = vmatprep.subr.mxu1 %v666_v48 }
 0x113   : > { %1215 = vmatpush3.msra.mxu1 %v666_v48 }
 0x1b4   : > { %v1106_v50 = vpop.f32.mrf.mxu1 }
 0x1b5   : > { %v577_v51 = vadd.f32 %v1106_v50, %v916_v49 }
 0x1b6   : > { %v571_v52 = vpop.f32.mrf.mxu1 }
 0x1b7   : > { %v572_v53 = vadd.f32 %v916_v49, %v571_v52  ;;  %v651_v56 = vmax.f32 %v577_v51, 0.0 }
 0x1b8   : > { %v1109_v54 = vpop.f32.mrf.mxu1 }
 0x1b9   : > { %v650_v55 = vmax.f32 %v572_v53, 0.0  ;;  %v587_v57 = vadd.f32 %v1109_v54, %v916_v49 }
 0x1ba   : > { %v581_v58 = vpop.f32.mrf.mxu1 }
 0x1bb   : > { %v582_v59 = vadd.f32 %v916_v49, %v581_v58  ;;  %1160 = vmatprep.mubr.f32.mxu0 %v650_v55  ;;  %v653_v62 = vmax.f32 %v587_v57, 0.0 }
 0x1bc   : > { %v1112_v60 = vpop.f32.mrf.mxu1  ;;  %1161 = vmatmul.mubr.f32.vlgmr.msra.gmra.mxu0 %v651_v56 }
 0x1bd   : > { %v652_v61 = vmax.f32 %v582_v59, 0.0  ;;  %v597_v63 = vadd.f32 %v1112_v60, %v916_v49 }
 0x1be   : > { %v591_v0 = vpop.f32.mrf.mxu1 }
 0x1bf   : > { %v592_v1 = vadd.f32 %v916_v49, %v591_v0  ;;  %1163 = vmatprep.mubr.f32.mxu0 %v652_v61  ;;  %v655_v4 = vmax.f32 %v597_v63, 0.0 }
 0x1c0   : > { %v1115_v2 = vpop.f32.mrf.mxu1  ;;  %1164 = vmatmul.mubr.f32.gmra.mxu0 %v653_v62 }
 0x1c1   : > { %v654_v3 = vmax.f32 %v592_v1, 0.0  ;;  %v607_v5 = vadd.f32 %v1115_v2, %v916_v49 }
 0x1c2   : > { %v601_v6 = vpop.f32.mrf.mxu1 }
 0x1c3   : > { %v602_v7 = vadd.f32 %v916_v49, %v601_v6  ;;  %1166 = vmatprep.mubr.f32.mxu0 %v654_v3  ;;  %v657_v10 = vmax.f32 %v607_v5, 0.0 }
 0x1c4   : > { %v1118_v8 = vpop.f32.mrf.mxu1  ;;  %1167 = vmatmul.mubr.f32.gmra.mxu0 %v655_v4 }
 0x1c5   : > { %v656_v9 = vmax.f32 %v602_v7, 0.0  ;;  %v617_v11 = vadd.f32 %v1118_v8, %v916_v49 }
 0x1c6   : > { %v611_v12 = vpop.f32.mrf.mxu1 }
 0x1c7   : > { %v612_v13 = vadd.f32 %v916_v49, %v611_v12  ;;  %1169 = vmatprep.mubr.f32.mxu0 %v656_v9  ;;  %v659_v16 = vmax.f32 %v617_v11, 0.0 }
 0x1c8   : > { %v1121_v14 = vpop.f32.mrf.mxu1  ;;  %1170 = vmatmul.mubr.f32.gmra.mxu0 %v657_v10 }
 0x1c9   : > { %v658_v15 = vmax.f32 %v612_v13, 0.0  ;;  %v627_v17 = vadd.f32 %v1121_v14, %v916_v49 }
 0x1ca   : > { %v621_v18 = vpop.f32.mrf.mxu1 }
 0x1cb   : > { %v622_v19 = vadd.f32 %v916_v49, %v621_v18  ;;  %1172 = vmatprep.mubr.f32.mxu1 %v658_v15  ;;  %v661_v22 = vmax.f32 %v627_v17, 0.0 }
 0x1cc   : > { %v1124_v20 = vpop.f32.mrf.mxu1  ;;  %1173 = vmatmul.mubr.f32.vlgmr.msra.gmra.mxu1 %v659_v16 }
 0x1cd   : > { %v660_v21 = vmax.f32 %v622_v19, 0.0  ;;  %v637_v23 = vadd.f32 %v1124_v20, %v916_v49 }
 0x1ce   : > { %v631_v24 = vpop.f32.mrf.mxu1 }
 0x1cf   : > { %v632_v25 = vadd.f32 %v916_v49, %v631_v24  ;;  %1175 = vmatprep.mubr.f32.mxu1 %v660_v21  ;;  %v663_v28 = vmax.f32 %v637_v23, 0.0 }
 0x1d0   : > { %v1127_v26 = vpop.f32.mrf.mxu1  ;;  %1176 = vmatmul.mubr.f32.gmra.mxu1 %v661_v22 }
 0x1d1   : > { %v662_v27 = vmax.f32 %v632_v25, 0.0  ;;  %v647_v29 = vadd.f32 %v1127_v26, %v916_v49 }
 0x1d2   : > { %v641_v30 = vpop.f32.mrf.mxu1 }
 0x1d3   : > { %v642_v31 = vadd.f32 %v916_v49, %v641_v30  ;;  %1178 = vmatprep.mubr.f32.mxu1 %v662_v27  ;;  %v665_v33 = vmax.f32 %v647_v29, 0.0 }
 0x1d4   : > { %1179 = vmatmul.mubr.f32.gmra.mxu1 %v663_v28 }
 0x1d5   : > { %v664_v32 = vmax.f32 %v642_v31, 0.0 }
 0x1d7   : > { %1181 = vmatprep.mubr.f32.mxu1 %v664_v32 }
 0x1d8   : > { %1182 = vmatmul.mubr.f32.gmra.mxu1 %v665_v33 }
 0x27c   : > { %v1162_v35 = vpop.f32.mrf.mxu0 }
 0x27d   : > { %v761_v36 = vadd.f32 %v1162_v35, %v917_v34 }
 0x27e   : > { %v755_v37 = vpop.f32.mrf.mxu0 }
 0x27f   : > { %835 = vst [vmem:[%s1530_s13 + $0x8] sm:$0xff] %v761_v36  ;;  %v756_v38 = vadd.f32 %v917_v34, %v755_v37 }
 0x280   : > { %v1165_v39 = vpop.f32.mrf.mxu0 }
 0x281   : > { %834 = vst [vmem:[%s1530_s13] sm:$0xff] %v756_v38  ;;  %v771_v40 = vadd.f32 %v1165_v39, %v917_v34 }
 0x282   : > { %v765_v41 = vpop.f32.mrf.mxu0 }
 0x283   : > { %837 = vst [vmem:[%s1530_s13 + $0x18] sm:$0xff] %v771_v40  ;;  %v766_v42 = vadd.f32 %v917_v34, %v765_v41 }
 0x284   : > { %v1168_v43 = vpop.f32.mrf.mxu0 }
 0x285   : > { %836 = vst [vmem:[%s1530_s13 + $0x10] sm:$0xff] %v766_v42  ;;  %v781_v44 = vadd.f32 %v1168_v43, %v917_v34 }
 0x286   : > { %v775_v45 = vpop.f32.mrf.mxu0 }
 0x287   : > { %839 = vst [vmem:[%s1530_s13 + $0x28] sm:$0xff] %v781_v44  ;;  %v776_v46 = vadd.f32 %v917_v34, %v775_v45 }
 0x288   : > { %v1171_v47 = vpop.f32.mrf.mxu0 }
 0x289   : > { %838 = vst [vmem:[%s1530_s13 + $0x20] sm:$0xff] %v776_v46  ;;  %v791_v48 = vadd.f32 %v1171_v47, %v917_v34 }
 0x28a   : > { %v785_v49 = vpop.f32.mrf.mxu0 }
 0x28b   : > { %841 = vst [vmem:[%s1530_s13 + $0x38] sm:$0xff] %v791_v48  ;;  %v786_v50 = vadd.f32 %v917_v34, %v785_v49 }
 0x28c   : > { %v1174_v51 = vpop.f32.mrf.mxu1 }
 0x28d   : > { %840 = vst [vmem:[%s1530_s13 + $0x30] sm:$0xff] %v786_v50  ;;  %v801_v52 = vadd.f32 %v1174_v51, %v917_v34 }
 0x28e   : > { %v795_v53 = vpop.f32.mrf.mxu1 }
 0x28f   : > { %843 = vst [vmem:[%s1530_s13 + $0x48] sm:$0xff] %v801_v52  ;;  %v796_v54 = vadd.f32 %v917_v34, %v795_v53 }
 0x290   : > { %v1177_v55 = vpop.f32.mrf.mxu1 }
 0x291   : > { %842 = vst [vmem:[%s1530_s13 + $0x40] sm:$0xff] %v796_v54  ;;  %v811_v56 = vadd.f32 %v1177_v55, %v917_v34 }
 0x292   : > { %v805_v57 = vpop.f32.mrf.mxu1 }
 0x293   : > { %845 = vst [vmem:[%s1530_s13 + $0x58] sm:$0xff] %v811_v56  ;;  %v806_v58 = vadd.f32 %v917_v34, %v805_v57 }
 0x294   : > { %v1180_v59 = vpop.f32.mrf.mxu1 }
 0x295   : > { %844 = vst [vmem:[%s1530_s13 + $0x50] sm:$0xff] %v806_v58  ;;  %v821_v60 = vadd.f32 %v1180_v59, %v917_v34 }
 0x296   : > { %v815_v61 = vpop.f32.mrf.mxu1 }
 0x297   : > { %847 = vst [vmem:[%s1530_s13 + $0x68] sm:$0xff] %v821_v60  ;;  %v816_v62 = vadd.f32 %v917_v34, %v815_v61 }
 0x298   : > { %v1183_v63 = vpop.f32.mrf.mxu1 }
 0x299   : > { %846 = vst [vmem:[%s1530_s13 + $0x60] sm:$0xff] %v816_v62  ;;  %v831_v0 = vadd.f32 %v1183_v63, %v917_v34 }
 0x29a   : > { %v825_v1 = vpop.f32.mrf.mxu1 }
 0x29b   : > { %849 = vst [vmem:[%s1530_s13 + $0x78] sm:$0xff] %v831_v0  ;;  %v826_v2 = vadd.f32 %v917_v34, %v825_v1 }
 0x29d   : > { %848 = vst [vmem:[%s1530_s13 + $0x70] sm:$0xff] %v826_v2 }
 0x29e PF: > { %s17_s24 = sadd.s32 1, %s1230_s24  }
 0x29f   : > { %p14_p4 = scmp.ge.s32.totalorder %s17_s24, 4  }
 0x2a1   :  { %16 = sbr.rel (!%p14_p4) target bundleno = 1 (0x1), region = 78 }

</bundles_post_ra>
